<compile_context>
chip_gen: v6e
topology: v6e:2x2x1
jax: 0.10.0
libtpu: 0.0.40
codegen_flags: <defaults>
</compile_context>

<pallas_src>
import functools

import jax
import jax.numpy as jnp
from jax import lax
from jax.experimental import pallas as pl
from jax.experimental.pallas import tpu as pltpu


def _round_up(n, m):
    return ((n + m - 1) // m) * m


def _pick_time_chunk(T, bytes_per_step, target_tc=64, max_chunk_bytes=4 << 20):
    """Largest divisor of T that is <= target_tc and keeps one streamed xproj
    chunk under max_chunk_bytes, so 2 pipeline buffers + the resident weight
    matrices stay inside the default scoped-VMEM limit (16 MiB on v5e,
    32 MiB on v6e/v7x) with headroom."""
    tc = max(1, min(T, target_tc,
                    max(1, max_chunk_bytes // max(bytes_per_step, 1))))
    while T % tc != 0:
        tc -= 1
    return tc


def _rnn_fc_kernel(xproj_ref,   # (Tc, Bp, Hp)  mxu_dtype, streamed time chunk
                   w_hh_t_ref,  # (Hp, Hp)      mxu_dtype (= W_hh^T), resident
                   w_fc_t_ref,  # (Hp, Op)      mxu_dtype (= W_fc^T), resident
                   b_fc_ref,    # (1, Op)       float32, resident
                   out_ref,     # (Bp, Op)      float32 lane-dense output slab
                   h_ref):      # VMEM scratch (Bp, Hp) float32 hidden state
    tb = pl.program_id(0)

    @pl.when(tb == 0)
    def _():
        h_ref[...] = jnp.zeros_like(h_ref)

    w_hh_t = w_hh_t_ref[...]
    tc = xproj_ref.shape[0]

    # Serial recurrence: h_t = tanh(xproj[t] + h_{t-1} @ W_hh^T).
    # The loop-carried dependence forbids overlapping consecutive steps; the
    # bounded unroll only removes loop overhead.
    def step(t, h):
        pre = xproj_ref[t].astype(jnp.float32) + jnp.dot(
            h.astype(w_hh_t.dtype), w_hh_t, preferred_element_type=jnp.float32)
        return jnp.tanh(pre)

    h_ref[...] = lax.fori_loop(0, tc, step, h_ref[...], unroll=min(4, tc))

    # Final FC on the last hidden state; written (and DMA'd back) only once.
    @pl.when(tb == pl.num_programs(0) - 1)
    def _():
        out_ref[...] = jnp.dot(
            h_ref[...].astype(w_fc_t_ref.dtype), w_fc_t_ref[...],
            preferred_element_type=jnp.float32) + b_fc_ref[...]


def prepare_rnn_params(w_ih, w_hh, b_ih, b_hh, w_fc, b_fc,
                       mxu_dtype=jnp.float32):
    """One-time layout plumbing (these are parameters, not per-call data):
    transpose and zero-pad the recurrent / FC weights to lane-dense shapes.
    mxu_dtype=bfloat16 is the recommended setting on v6e/v7x at realistic H
    (f32 accumulation and an f32 hidden carry are kept inside the kernel)."""
    H, _ = w_ih.shape
    O = w_fc.shape[0]
    Hp = _round_up(max(H, 128), 128)
    Op = _round_up(max(O, 128), 128)
    f32 = jnp.float32
    return dict(
        w_ih=w_ih.astype(f32),                                    # (H, I), used by XLA einsum
        b=(b_ih + b_hh).astype(f32),                              # (H,)
        w_hh_t=jnp.pad(w_hh.T.astype(f32),
                       ((0, Hp - H), (0, Hp - H))).astype(mxu_dtype),
        w_fc_t=jnp.pad(w_fc.T.astype(f32),
                       ((0, Hp - H), (0, Op - O))).astype(mxu_dtype),
        b_fc=jnp.pad(b_fc.astype(f32), (0, Op - O)).reshape(1, Op),
    )


@functools.partial(jax.jit, static_argnames=("out_features", "time_chunk"))
def rnn_model_forward(x, w_ih, b, w_hh_t, w_fc_t, b_fc_p, *,
                      out_features, time_chunk=64):
    """x: (B, T, I) batch-first, like the PyTorch module.  Returns (B, O)."""
    B, T, _ = x.shape
    H = w_ih.shape[0]
    Hp = w_hh_t.shape[0]
    Op = w_fc_t.shape[1]
    Bp = _round_up(max(B, 8), 8)
    f32 = jnp.float32

    # Hoisted input projection: one large, fully parallel matmul that XLA runs
    # at full MXU rate and fuses with the transpose/pad.  Only the (T, Bp, Hp)
    # result enters the kernel; x's I-dim is never padded or re-materialized.
    xproj = jnp.einsum("bti,hi->tbh", x.astype(f32), w_ih,
                       preferred_element_type=f32) + b            # (T, B, H)
    xproj = jnp.pad(xproj, ((0, 0), (0, Bp - B), (0, Hp - H)))     # (T, Bp, Hp)
    xproj = xproj.astype(w_hh_t.dtype)   # bf16 halves streamed bytes on v6e/v7x

    itemsize = jnp.dtype(w_hh_t.dtype).itemsize
    tc = _pick_time_chunk(T, Bp * Hp * itemsize, target_tc=time_chunk)

    out_pad = pl.pallas_call(
        _rnn_fc_kernel,
        out_shape=jax.ShapeDtypeStruct((Bp, Op), f32),
        grid_spec=pltpu.PrefetchScalarGridSpec(
            num_scalar_prefetch=0,
            grid=(T // tc,),
            in_specs=[
                pl.BlockSpec((tc, Bp, Hp), lambda t: (t, 0, 0)),   # streamed xproj
                pl.BlockSpec((Hp, Hp), lambda t: (0, 0)),          # W_hh^T resident
                pl.BlockSpec((Hp, Op), lambda t: (0, 0)),          # W_fc^T resident
                pl.BlockSpec((1, Op), lambda t: (0, 0)),           # b_fc resident
            ],
            out_specs=pl.BlockSpec((Bp, Op), lambda t: (0, 0)),    # written once
            scratch_shapes=[pltpu.VMEM((Bp, Hp), f32)],            # hidden state
        ),
        compiler_params=pltpu.CompilerParams(
            # The time axis carries the recurrence state -> strictly serial.
            dimension_semantics=("arbitrary",),
        ),
    )(xproj, w_hh_t, w_fc_t, b_fc_p)

    return out_pad[:B, :out_features]


def _reference_forward(x, w_ih, w_hh, b_ih, b_hh, w_fc, b_fc):
    """Pure-JAX reference of the PyTorch forward, for a sanity check."""
    B, T, _ = x.shape
    H = w_ih.shape[0]
    h = jnp.zeros((B, H), jnp.float32)
    for t in range(T):
        h = jnp.tanh(x[:, t, :] @ w_ih.T + b_ih + h @ w_hh.T + b_hh)
    return h @ w_fc.T + b_fc


if __name__ == "__main__":
    # Small shapes consistent with the module:
    B, T = 2, 8            # batch, sequence length
    I, H, O = 4, 32, 8     # input_size, hidden_size, output_size

    key = jax.random.PRNGKey(0)
    ks = jax.random.split(key, 7)
    scale = 1.0 / jnp.sqrt(H)   # mimic PyTorch's U(-1/sqrt(H), 1/sqrt(H)) init
    x = jax.random.normal(ks[0], (B, T, I), jnp.float32)
    w_ih = jax.random.uniform(ks[1], (H, I), jnp.float32, -scale, scale)
    w_hh = jax.random.uniform(ks[2], (H, H), jnp.float32, -scale, scale)
    b_ih = jax.random.uniform(ks[3], (H,), jnp.float32, -scale, scale)
    b_hh = jax.random.uniform(ks[4], (H,), jnp.float32, -scale, scale)
    w_fc = jax.random.uniform(ks[5], (O, H), jnp.float32, -scale, scale)
    b_fc = jax.random.uniform(ks[6], (O,), jnp.float32, -scale, scale)

    ref = _reference_forward(x, w_ih, w_hh, b_ih, b_hh, w_fc, b_fc)

    # (1) f32 MXU operands, forced multi-step time grid (Tc=4 -> 2 grid steps)
    #     to exercise the streamed-state path; tight tolerance vs f32 ref.
    p32 = prepare_rnn_params(w_ih, w_hh, b_ih, b_hh, w_fc, b_fc,
                             mxu_dtype=jnp.float32)
    out = rnn_model_forward(x, p32["w_ih"], p32["b"], p32["w_hh_t"],
                            p32["w_fc_t"], p32["b_fc"],
                            out_features=O, time_chunk=4)
    out = jax.block_until_ready(out)
    assert out.shape == (B, O), out.shape
    assert jnp.allclose(out, ref, atol=1e-5, rtol=1e-5), (
        f"f32 max abs err {jnp.max(jnp.abs(out - ref))}")

    # (2) bf16 MXU operands (the v6e/v7x-recommended setting); looser tolerance
    #     since rounding in the sequential tanh recurrence compounds over T.
    pbf = prepare_rnn_params(w_ih, w_hh, b_ih, b_hh, w_fc, b_fc,
                             mxu_dtype=jnp.bfloat16)
    out_bf = rnn_model_forward(x, pbf["w_ih"], pbf["b"], pbf["w_hh_t"],
                               pbf["w_fc_t"], pbf["b_fc"],
                               out_features=O)
    out_bf = jax.block_until_ready(out_bf)
    assert out_bf.shape == (B, O), out_bf.shape
    assert jnp.allclose(out_bf, ref, atol=3e-2, rtol=3e-2), (
        f"bf16 max abs err {jnp.max(jnp.abs(out_bf - ref))}")

    print("KERNEL_OK")
</pallas_src>

<mosaic_0001>
module attributes {stable_mosaic.version = 11 : i64} {
  func.func @_rnn_fc_kernel(%arg0: i32, %arg1: memref<4x8x128xf32, #tpu.memory_space<vmem>>, %arg2: memref<128x128xf32, #tpu.memory_space<vmem>>, %arg3: memref<128x128xf32, #tpu.memory_space<vmem>>, %arg4: memref<1x128xf32, #tpu.memory_space<vmem>>, %arg5: memref<8x128xf32, #tpu.memory_space<vmem>>, %arg6: memref<8x128xf32, #tpu.memory_space<vmem>>) attributes {dimension_semantics = [#tpu.dimension_semantics<arbitrary>], iteration_bounds = array<i64: 2>, scalar_prefetch = 0 : i64, scratch_operands = 1 : i64, tpu.core_type = #tpu.core_type<tc>, window_params = [{transform_indices = @transform_0, window_bounds = array<i64: 4, 8, 128>}, {pipeline_mode = #tpu.pipeline_mode<synchronous>, transform_indices = @transform_1, window_bounds = array<i64: 128, 128>}, {pipeline_mode = #tpu.pipeline_mode<synchronous>, transform_indices = @transform_2, window_bounds = array<i64: 128, 128>}, {pipeline_mode = #tpu.pipeline_mode<synchronous>, transform_indices = @transform_3, window_bounds = array<i64: 1, 128>}, {pipeline_mode = #tpu.pipeline_mode<synchronous>, transform_indices = @transform_4, window_bounds = array<i64: 8, 128>}]} {
    %c0_i32 = arith.constant 0 : i32
    %0 = arith.cmpi eq, %arg0, %c0_i32 : i32
    %1 = arith.extui %0 : i1 to i32
    %c0_i32_0 = arith.constant 0 : i32
    %2 = arith.cmpi ne, %1, %c0_i32_0 : i32
    scf.if %2 {
      %cst_20 = arith.constant 0.000000e+00 : f32
      %33 = vector.broadcast %cst_20 : f32 to vector<8x128xf32>
      %c0_21 = arith.constant 0 : index
      %c0_22 = arith.constant 0 : index
      %34 = vector.load %arg6[%c0_21, %c0_22] : memref<8x128xf32, #tpu.memory_space<vmem>>, vector<8x128xf32>
      tpu.vector_store %arg6[%c0_21, %c0_22], %33 {strides = array<i32>} : memref<8x128xf32, #tpu.memory_space<vmem>>, vector<8x128xf32>,
    } else {
    }
    %c0 = arith.constant 0 : index
    %c0_1 = arith.constant 0 : index
    %3 = vector.load %arg2[%c0, %c0_1] : memref<128x128xf32, #tpu.memory_space<vmem>>, vector<128x128xf32>
    %c0_2 = arith.constant 0 : index
    %c0_3 = arith.constant 0 : index
    %4 = vector.load %arg6[%c0_2, %c0_3] : memref<8x128xf32, #tpu.memory_space<vmem>>, vector<8x128xf32>
    %c0_i32_4 = arith.constant 0 : i32
    %5 = arith.index_cast %c0_i32_4 : i32 to index
    %c0_5 = arith.constant 0 : index
    %c0_6 = arith.constant 0 : index
    %6 = vector.load %arg1[%5, %c0_5, %c0_6] : memref<4x8x128xf32, #tpu.memory_space<vmem>>, vector<1x8x128xf32>
    %7 = vector.shape_cast %6 : vector<1x8x128xf32> to vector<8x128xf32>
    %cst = arith.constant dense<0.000000e+00> : vector<8x128xf32>
    %8 = tpu.matmul %4, %3, %cst {dimension_numbers = #tpu.dot_dimension_numbers<[1], [0], [0], [1], [0, 0, 1, 1], [], []>} : vector<8x128xf32>, vector<128x128xf32>, vector<8x128xf32> -> vector<8x128xf32>
    %9 = arith.addf %7, %8 : vector<8x128xf32>
    %10 = math.tanh %9 : vector<8x128xf32>
    %c1_i32 = arith.constant 1 : i32
    %11 = arith.index_cast %c1_i32 : i32 to index
    %c0_7 = arith.constant 0 : index
    %c0_8 = arith.constant 0 : index
    %12 = vector.load %arg1[%11, %c0_7, %c0_8] : memref<4x8x128xf32, #tpu.memory_space<vmem>>, vector<1x8x128xf32>
    %13 = vector.shape_cast %12 : vector<1x8x128xf32> to vector<8x128xf32>
    %cst_9 = arith.constant dense<0.000000e+00> : vector<8x128xf32>
    %14 = tpu.matmul %10, %3, %cst_9 {dimension_numbers = #tpu.dot_dimension_numbers<[1], [0], [0], [1], [0, 0, 1, 1], [], []>} : vector<8x128xf32>, vector<128x128xf32>, vector<8x128xf32> -> vector<8x128xf32>
    %15 = arith.addf %13, %14 : vector<8x128xf32>
    %16 = math.tanh %15 : vector<8x128xf32>
    %c2_i32 = arith.constant 2 : i32
    %17 = arith.index_cast %c2_i32 : i32 to index
    %c0_10 = arith.constant 0 : index
    %c0_11 = arith.constant 0 : index
    %18 = vector.load %arg1[%17, %c0_10, %c0_11] : memref<4x8x128xf32, #tpu.memory_space<vmem>>, vector<1x8x128xf32>
    %19 = vector.shape_cast %18 : vector<1x8x128xf32> to vector<8x128xf32>
    %cst_12 = arith.constant dense<0.000000e+00> : vector<8x128xf32>
    %20 = tpu.matmul %16, %3, %cst_12 {dimension_numbers = #tpu.dot_dimension_numbers<[1], [0], [0], [1], [0, 0, 1, 1], [], []>} : vector<8x128xf32>, vector<128x128xf32>, vector<8x128xf32> -> vector<8x128xf32>
    %21 = arith.addf %19, %20 : vector<8x128xf32>
    %22 = math.tanh %21 : vector<8x128xf32>
    %c3_i32 = arith.constant 3 : i32
    %23 = arith.index_cast %c3_i32 : i32 to index
    %c0_13 = arith.constant 0 : index
    %c0_14 = arith.constant 0 : index
    %24 = vector.load %arg1[%23, %c0_13, %c0_14] : memref<4x8x128xf32, #tpu.memory_space<vmem>>, vector<1x8x128xf32>
    %25 = vector.shape_cast %24 : vector<1x8x128xf32> to vector<8x128xf32>
    %cst_15 = arith.constant dense<0.000000e+00> : vector<8x128xf32>
    %26 = tpu.matmul %22, %3, %cst_15 {dimension_numbers = #tpu.dot_dimension_numbers<[1], [0], [0], [1], [0, 0, 1, 1], [], []>} : vector<8x128xf32>, vector<128x128xf32>, vector<8x128xf32> -> vector<8x128xf32>
    %27 = arith.addf %25, %26 : vector<8x128xf32>
    %28 = math.tanh %27 : vector<8x128xf32>
    %c4_i32 = arith.constant 4 : i32
    %c0_16 = arith.constant 0 : index
    %c0_17 = arith.constant 0 : index
    %29 = vector.load %arg6[%c0_16, %c0_17] : memref<8x128xf32, #tpu.memory_space<vmem>>, vector<8x128xf32>
    tpu.vector_store %arg6[%c0_16, %c0_17], %28 {strides = array<i32>} : memref<8x128xf32, #tpu.memory_space<vmem>>, vector<8x128xf32>,
    %c1_i32_18 = arith.constant 1 : i32
    %30 = arith.cmpi eq, %arg0, %c1_i32_18 : i32
    %31 = arith.extui %30 : i1 to i32
    %c0_i32_19 = arith.constant 0 : i32
    %32 = arith.cmpi ne, %31, %c0_i32_19 : i32
    scf.if %32 {
      %c0_20 = arith.constant 0 : index
      %c0_21 = arith.constant 0 : index
      %33 = vector.load %arg6[%c0_20, %c0_21] : memref<8x128xf32, #tpu.memory_space<vmem>>, vector<8x128xf32>
      %c0_22 = arith.constant 0 : index
      %c0_23 = arith.constant 0 : index
      %34 = vector.load %arg3[%c0_22, %c0_23] : memref<128x128xf32, #tpu.memory_space<vmem>>, vector<128x128xf32>
      %cst_24 = arith.constant dense<0.000000e+00> : vector<8x128xf32>
      %35 = tpu.matmul %33, %34, %cst_24 {dimension_numbers = #tpu.dot_dimension_numbers<[1], [0], [0], [1], [0, 0, 1, 1], [], []>} : vector<8x128xf32>, vector<128x128xf32>, vector<8x128xf32> -> vector<8x128xf32>
      %c0_25 = arith.constant 0 : index
      %c0_26 = arith.constant 0 : index
      %36 = vector.load %arg4[%c0_25, %c0_26] : memref<1x128xf32, #tpu.memory_space<vmem>>, vector<1x128xf32>
      %37 = vector.broadcast %36 : vector<1x128xf32> to vector<8x128xf32>
      %38 = arith.addf %35, %37 : vector<8x128xf32>
      %c0_27 = arith.constant 0 : index
      %c0_28 = arith.constant 0 : index
      %39 = vector.load %arg5[%c0_27, %c0_28] : memref<8x128xf32, #tpu.memory_space<vmem>>, vector<8x128xf32>
      tpu.vector_store %arg5[%c0_27, %c0_28], %38 {strides = array<i32>} : memref<8x128xf32, #tpu.memory_space<vmem>>, vector<8x128xf32>,
    } else {
    }
    return
  }
  func.func @transform_0(%arg0: i32) -> (i32, i32, i32) {
    %c0_i32 = arith.constant 0 : i32
    %c0_i32_0 = arith.constant 0 : i32
    %c0_i32_1 = arith.constant 0 : i32
    return %arg0, %c0_i32, %c0_i32_0 : i32, i32, i32
  }
  func.func @transform_1(%arg0: i32) -> (i32, i32) {
    %c0_i32 = arith.constant 0 : i32
    %c0_i32_0 = arith.constant 0 : i32
    %c0_i32_1 = arith.constant 0 : i32
    return %c0_i32, %c0_i32_0 : i32, i32
  }
  func.func @transform_2(%arg0: i32) -> (i32, i32) {
    %c0_i32 = arith.constant 0 : i32
    %c0_i32_0 = arith.constant 0 : i32
    %c0_i32_1 = arith.constant 0 : i32
    return %c0_i32, %c0_i32_0 : i32, i32
  }
  func.func @transform_3(%arg0: i32) -> (i32, i32) {
    %c0_i32 = arith.constant 0 : i32
    %c0_i32_0 = arith.constant 0 : i32
    %c0_i32_1 = arith.constant 0 : i32
    return %c0_i32, %c0_i32_0 : i32, i32
  }
  func.func @transform_4(%arg0: i32) -> (i32, i32) {
    %c0_i32 = arith.constant 0 : i32
    %c0_i32_0 = arith.constant 0 : i32
    %c0_i32_1 = arith.constant 0 : i32
    return %c0_i32, %c0_i32_0 : i32, i32
  }
}

</mosaic_0001>

<bundles_post_ra>
// kernel: rnn_model_forward.1
= control target key start
LH: loop header
LB: loop body
LE: loop exit
PB: predicated region body
PF: predicated region fallthrough
CT: control target
= control target key end

     0   :  { %9 = vsyncpa [#allocation4], 0  ;;  %s1038_s15 = smov 0   ;;  %s1305_s0 = inlined_call_operand.vmem [shape: f32[8,8,128], index: 0, kind: input, shape index: {}]   ;;  %s1306_s1 = inlined_call_operand.vmem [shape: f32[128,128], index: 1, kind: input, shape index: {}]   ;;  %s1307_s2 = inlined_call_operand.hbm [shape: f32[128,128], index: 2, kind: input, shape index: {}]   ;;  %s1308_s3 = inlined_call_operand.vmem [shape: f32[1,128], index: 3, kind: input, shape index: {}]   ;;  %s1309_s4 = inlined_call_operand.vmem [shape: f32[8,128], index: 4, kind: output, shape index: {}]  }
   0x1 LB: > { %s1044_s16 = sadd.s32 4294967295, %s1003_s15   ;;  %p658_p0 = scmp.ge.s32.totalorder %s1003_s15, 1  ;;  %s1003_s15 = sphi %s1038_s15, %s15_s15  }
   0x2   : > { %p130_p1 = scmp.lt.s32.totalorder %s1003_s15, 3  ;;  %s1005_s17 = smov [#allocation3]  }
   0x3   : > { %s145_s18 = sshll.u32 %s1005_s17, 4  ;;  %p941_p4 = scmp.eq.s32.totalorder %s1044_s16, 0  ;;  %s146_s18 = int_to_ptr.vmem [resolvable:$true] %s145_s18 }
   0x4   : > { %p1049_p3 = pnand %p658_p0, %p130_p1  ;;  %s978_s20 = scalar_lea.vmem %s146_s18, 2048 }
   0x5   : > { %p979_p8 = scmp.ne.s32.totalorder %s146_s18, %s978_s20  ;;  %p986_p11 = scmp.lt.s32.totalorder %s146_s18, %s146_s18 }
   0x6   : > { %p937_p5 = pneg %p1049_p3  ;;  %p987_p12 = scmp.lt.s32.totalorder %s978_s20, %s978_s20 }
   0x8   : > { %p938_p6 = pnand %p941_p4, %p937_p5  ;;  %p988_p13 = por %p987_p12, %p986_p11 }
   0xa   : > { %p969_p7 = pneg %p938_p6 }
   0xc   : > { %p981_p9 = pnand %p979_p8, %p969_p7 }
   0xe   : > { %p982_p10 = pneg %p981_p9 }
  0x10   : > { %p989_p2 = pnand %p988_p13, %p982_p10 }
  0x12   : > { %992 = shalt.err (!%p989_p2)
}
  0x13   : > { %s1006_s21 = smov 128   ;;  %s1007_s22 = smov 8  }
  0x14   : > { %940 = dma.hbm_to_vmem [thread:$0]  (!%p938_p6), %s1307_s2, 2048, %s146_s18, [#allocation4], %s1006_s21, %s1006_s21, %s1007_s22  }
  0x15   : > { %173 = sbr.rel (%p1049_p3) target bundleno = 1135 (0x46f), region = 36 }
  0x1a   : > { %998 = dma.done.wait (%p941_p4), [#allocation4], 2048  }
  0x1b   : > { %1000 = vsyncadd (%p941_p4), [#allocation4], 4294965248  ;;  %s663_s25 = sshll.u32 %s1044_s16, 2  ;;  %p1311_p1 = scmp.ne.s32.totalorder %s1044_s16, 0 }
  0x1c   : > { %p195_p0 = scmp.lt.s32.totalorder %s663_s25, 7 }
  0x1d   : > { %203 = sbr.rel (%p1311_p1) target bundleno = 36 (0x24), region = 44 }
  0x1e   : > { %s1313_s25 = smov (!%p195_p0, %s663_s25), 7 }
  0x1f   : > { %s664_s26 = sshll.u32 %s1313_s25, 3 }
  0x20   : > { %s1071_s29 = scalar_lea.vmem %s1305_s0, %s664_s26 }
  0x22   : > { %v1008_v0 = vmov 0.0  }
  0x23   : > { %204 = vst [vmem:[#allocation2] sm:$0xff] %v1008_v0 }
  0x24 PF: > { %v1078_v1 = vld [vmem:[%s1306_s1 + $0x78] sm:$0xff]  ;;  %v1009_v2 = vmov 0.0   ;;  %v1084_v3 = vld [vmem:[%s1306_s1 + $0x70] sm:$0xff]  ;;  %vm1010_vm0 = vmmov 0   ;;  %v1094_v4 = vld [vmem:[%s1306_s1 + $0x68] sm:$0xff]  ;;  %p669_p2 = scmp.ne.s32.totalorder %s1044_s16, 1 }
  0x25   : > { %758 = vmatprep.subr.mxu0 %v1009_v2  ;;  %790 = vmatprep.mubr.msk.f32.mxu0 %vm1010_vm0, %v1009_v2  ;;  %v1103_v5 = vld [vmem:[%s1306_s1 + $0x60] sm:$0xff]  ;;  %v1112_v6 = vld [vmem:[%s1306_s1 + $0x58] sm:$0xff]  ;;  %v1121_v7 = vld [vmem:[%s1306_s1 + $0x50] sm:$0xff] }
  0x26   : > { %759 = vmatpush3.msra.mxu0 %v1078_v1  ;;  %793 = vmatprep.subr.mxu1 %v1009_v2  ;;  %v1130_v8 = vld [vmem:[%s1306_s1 + $0x48] sm:$0xff]  ;;  %v1139_v9 = vld [vmem:[%s1306_s1 + $0x40] sm:$0xff]  ;;  %v1148_v10 = vld [vmem:[%s1306_s1 + $0x38] sm:$0xff] }
  0x27   : > { %760 = vmatprep.subr.mxu0 %v1009_v2  ;;  %794 = vmatpush3.msra.mxu1 %v1078_v1  ;;  %v1157_v11 = vld [vmem:[%s1306_s1 + $0x30] sm:$0xff]  ;;  %v1166_v12 = vld [vmem:[%s1306_s1 + $0x28] sm:$0xff]  ;;  %v1175_v13 = vld [vmem:[%s1306_s1 + $0x20] sm:$0xff] }
  0x28   : > { %761 = vmatpush3.msra.mxu0 %v1084_v3  ;;  %795 = vmatprep.subr.mxu1 %v1009_v2  ;;  %v1184_v14 = vld [vmem:[%s1306_s1 + $0x18] sm:$0xff]  ;;  %v1193_v15 = vld [vmem:[%s1306_s1 + $0x10] sm:$0xff]  ;;  %v1202_v16 = vld [vmem:[%s1306_s1 + $0x8] sm:$0xff] }
  0x29   : > { %762 = vmatprep.subr.mxu0 %v1009_v2  ;;  %796 = vmatpush3.msra.mxu1 %v1084_v3  ;;  %v1211_v17 = vld [vmem:[%s1306_s1] sm:$0xff]  ;;  %v666_v24 = vld [vmem:[%s1071_s29 + $0x8] sm:$0xff]  ;;  %v667_v29 = vld [vmem:[%s1071_s29 + $0x10] sm:$0xff] }
  0x2a   : > { %763 = vmatpush3.msra.mxu0 %v1094_v4  ;;  %797 = vmatprep.subr.mxu1 %v1009_v2  ;;  %v221_v18 = vld [vmem:[#allocation2] sm:$0xff]  ;;  %v668_v34 = vld [vmem:[%s1071_s29 + $0x18] sm:$0xff] }
  0x2b   : > { %764 = vmatprep.subr.mxu0 %v1009_v2  ;;  %798 = vmatpush3.msra.mxu1 %v1094_v4  ;;  %v222_v19 = vld [vmem:[%s1071_s29] sm:$0xff] }
  0x2c   : > { %765 = vmatpush3.msra.mxu0 %v1103_v5  ;;  %799 = vmatprep.subr.mxu1 %v1009_v2 }
  0x2d   : > { %766 = vmatprep.subr.mxu0 %v1009_v2  ;;  %800 = vmatpush3.msra.mxu1 %v1103_v5 }
  0x2e   : > { %767 = vmatpush3.msra.mxu0 %v1112_v6  ;;  %801 = vmatprep.subr.mxu1 %v1009_v2 }
  0x2f   : > { %768 = vmatprep.subr.mxu0 %v1009_v2  ;;  %802 = vmatpush3.msra.mxu1 %v1112_v6 }
  0x30   : > { %769 = vmatpush3.msra.mxu0 %v1121_v7  ;;  %803 = vmatprep.subr.mxu1 %v1009_v2 }
  0x31   : > { %770 = vmatprep.subr.mxu0 %v1009_v2  ;;  %804 = vmatpush3.msra.mxu1 %v1121_v7 }
  0x32   : > { %771 = vmatpush3.msra.mxu0 %v1130_v8  ;;  %805 = vmatprep.subr.mxu1 %v1009_v2 }
  0x33   : > { %772 = vmatprep.subr.mxu0 %v1009_v2  ;;  %806 = vmatpush3.msra.mxu1 %v1130_v8 }
  0x34   : > { %773 = vmatpush3.msra.mxu0 %v1139_v9  ;;  %807 = vmatprep.subr.mxu1 %v1009_v2 }
  0x35   : > { %774 = vmatprep.subr.mxu0 %v1009_v2  ;;  %808 = vmatpush3.msra.mxu1 %v1139_v9 }
  0x36   : > { %775 = vmatpush3.msra.mxu0 %v1148_v10  ;;  %809 = vmatprep.subr.mxu1 %v1009_v2 }
  0x37   : > { %776 = vmatprep.subr.mxu0 %v1009_v2  ;;  %810 = vmatpush3.msra.mxu1 %v1148_v10 }
  0x38   : > { %777 = vmatpush3.msra.mxu0 %v1157_v11  ;;  %811 = vmatprep.subr.mxu1 %v1009_v2 }
  0x39   : > { %778 = vmatprep.subr.mxu0 %v1009_v2  ;;  %812 = vmatpush3.msra.mxu1 %v1157_v11 }
  0x3a   : > { %779 = vmatpush3.msra.mxu0 %v1166_v12  ;;  %813 = vmatprep.subr.mxu1 %v1009_v2 }
  0x3b   : > { %780 = vmatprep.subr.mxu0 %v1009_v2  ;;  %814 = vmatpush3.msra.mxu1 %v1166_v12 }
  0x3c   : > { %781 = vmatpush3.msra.mxu0 %v1175_v13  ;;  %815 = vmatprep.subr.mxu1 %v1009_v2 }
  0x3d   : > { %782 = vmatprep.subr.mxu0 %v1009_v2  ;;  %816 = vmatpush3.msra.mxu1 %v1175_v13 }
  0x3e   : > { %783 = vmatpush3.msra.mxu0 %v1184_v14  ;;  %817 = vmatprep.subr.mxu1 %v1009_v2 }
  0x3f   : > { %784 = vmatprep.subr.mxu0 %v1009_v2  ;;  %818 = vmatpush3.msra.mxu1 %v1184_v14 }
  0x40   : > { %785 = vmatpush3.msra.mxu0 %v1193_v15  ;;  %819 = vmatprep.subr.mxu1 %v1009_v2 }
  0x41   : > { %786 = vmatprep.subr.mxu0 %v1009_v2  ;;  %820 = vmatpush3.msra.mxu1 %v1193_v15 }
  0x42   : > { %787 = vmatpush3.msra.mxu0 %v1202_v16  ;;  %821 = vmatprep.subr.mxu1 %v1009_v2 }
  0x43   : > { %788 = vmatprep.subr.mxu0 %v1009_v2  ;;  %822 = vmatpush3.msra.mxu1 %v1202_v16 }
  0x44   : > { %789 = vmatpush3.msra.mxu0 %v1211_v17  ;;  %823 = vmatprep.subr.mxu1 %v1009_v2 }
  0x45   : > { %791 = vmatmul.mubr.f32.vlgmr.msra.gmra.mxu0 %v221_v18  ;;  %824 = vmatpush3.msra.mxu1 %v1211_v17 }
  0x46   : > { %825 = vmatprep.mubr.msk.f32.mxu1 %vm1010_vm0, %v1009_v2  ;;  %828 = vmatprep.subr.mxu0 %v1009_v2 }
  0x47   : > { %829 = vmatpush3.msra.mxu0 %v1078_v1  ;;  %860 = vmatprep.mubr.msk.f32.mxu0 %vm1010_vm0, %v1009_v2 }
  0x48   : > { %830 = vmatprep.subr.mxu0 %v1009_v2  ;;  %863 = vmatprep.subr.mxu1 %v1009_v2 }
  0x49   : > { %831 = vmatpush3.msra.mxu0 %v1084_v3 }
  0x4a   : > { %832 = vmatprep.subr.mxu0 %v1009_v2 }
  0x4b   : > { %833 = vmatpush3.msra.mxu0 %v1094_v4 }
  0x4c   : > { %834 = vmatprep.subr.mxu0 %v1009_v2 }
  0x4d   : > { %835 = vmatpush3.msra.mxu0 %v1103_v5 }
  0x4e   : > { %836 = vmatprep.subr.mxu0 %v1009_v2 }
  0x4f   : > { %837 = vmatpush3.msra.mxu0 %v1112_v6 }
  0x50   : > { %838 = vmatprep.subr.mxu0 %v1009_v2 }
  0x51   : > { %839 = vmatpush3.msra.mxu0 %v1121_v7 }
  0x52   : > { %840 = vmatprep.subr.mxu0 %v1009_v2 }
  0x53   : > { %841 = vmatpush3.msra.mxu0 %v1130_v8 }
  0x54   : > { %842 = vmatprep.subr.mxu0 %v1009_v2 }
  0x55   : > { %843 = vmatpush3.msra.mxu0 %v1139_v9 }
  0x56   : > { %844 = vmatprep.subr.mxu0 %v1009_v2 }
  0x57   : > { %845 = vmatpush3.msra.mxu0 %v1148_v10 }
  0x58   : > { %846 = vmatprep.subr.mxu0 %v1009_v2 }
  0x59   : > { %847 = vmatpush3.msra.mxu0 %v1157_v11 }
  0x5a   : > { %848 = vmatprep.subr.mxu0 %v1009_v2 }
  0x5b   : > { %849 = vmatpush3.msra.mxu0 %v1166_v12 }
  0x5c   : > { %850 = vmatprep.subr.mxu0 %v1009_v2 }
  0x5d   : > { %851 = vmatpush3.msra.mxu0 %v1175_v13 }
  0x5e   : > { %852 = vmatprep.subr.mxu0 %v1009_v2 }
  0x5f   : > { %853 = vmatpush3.msra.mxu0 %v1184_v14 }
  0x60   : > { %854 = vmatprep.subr.mxu0 %v1009_v2 }
  0x61   : > { %855 = vmatpush3.msra.mxu0 %v1193_v15 }
  0x62   : > { %856 = vmatprep.subr.mxu0 %v1009_v2 }
  0x63   : > { %857 = vmatpush3.msra.mxu0 %v1202_v16 }
  0x64   : > { %858 = vmatprep.subr.mxu0 %v1009_v2 }
  0x65   : > { %859 = vmatpush3.msra.mxu0 %v1211_v17 }
 0x105   : > { %v289_v20 = vpop.f32.mrf.mxu0 }
 0x106   : > { %v293_v21 = vadd.f32 %v289_v20, %v222_v19 }
 0x107   : > { %v792_v22 = vpop.f32.mrf.mxu0 }
 0x108   : > { %959 = vtanh.f32 %v293_v21 }
 0x115   : > { %v960_v23 = vpop.eup %959 }
 0x116   : > { %826 = vmatmul.mubr.f32.vlgmr.msra.gmra.mxu1 %v960_v23 }
 0x117   : > { %864 = vmatpush3.msra.mxu1 %v1078_v1  ;;  %895 = vmatprep.mubr.msk.f32.mxu1 %vm1010_vm0, %v1009_v2 }
 0x118   : > { %865 = vmatprep.subr.mxu1 %v1009_v2 }
 0x119   : > { %866 = vmatpush3.msra.mxu1 %v1084_v3 }
 0x11a   : > { %867 = vmatprep.subr.mxu1 %v1009_v2 }
 0x11b   : > { %868 = vmatpush3.msra.mxu1 %v1094_v4 }
 0x11c   : > { %869 = vmatprep.subr.mxu1 %v1009_v2 }
 0x11d   : > { %870 = vmatpush3.msra.mxu1 %v1103_v5 }
 0x11e   : > { %871 = vmatprep.subr.mxu1 %v1009_v2 }
 0x11f   : > { %872 = vmatpush3.msra.mxu1 %v1112_v6 }
 0x120   : > { %873 = vmatprep.subr.mxu1 %v1009_v2 }
 0x121   : > { %874 = vmatpush3.msra.mxu1 %v1121_v7 }
 0x122   : > { %875 = vmatprep.subr.mxu1 %v1009_v2 }
 0x123   : > { %876 = vmatpush3.msra.mxu1 %v1130_v8 }
 0x124   : > { %877 = vmatprep.subr.mxu1 %v1009_v2 }
 0x125   : > { %878 = vmatpush3.msra.mxu1 %v1139_v9 }
 0x126   : > { %879 = vmatprep.subr.mxu1 %v1009_v2 }
 0x127   : > { %880 = vmatpush3.msra.mxu1 %v1148_v10 }
 0x128   : > { %881 = vmatprep.subr.mxu1 %v1009_v2 }
 0x129   : > { %882 = vmatpush3.msra.mxu1 %v1157_v11 }
 0x12a   : > { %883 = vmatprep.subr.mxu1 %v1009_v2 }
 0x12b   : > { %884 = vmatpush3.msra.mxu1 %v1166_v12 }
 0x12c   : > { %885 = vmatprep.subr.mxu1 %v1009_v2 }
 0x12d   : > { %886 = vmatpush3.msra.mxu1 %v1175_v13 }
 0x12e   : > { %887 = vmatprep.subr.mxu1 %v1009_v2 }
 0x12f   : > { %888 = vmatpush3.msra.mxu1 %v1184_v14 }
 0x130   : > { %889 = vmatprep.subr.mxu1 %v1009_v2 }
 0x131   : > { %890 = vmatpush3.msra.mxu1 %v1193_v15 }
 0x132   : > { %891 = vmatprep.subr.mxu1 %v1009_v2 }
 0x133   : > { %892 = vmatpush3.msra.mxu1 %v1202_v16 }
 0x134   : > { %893 = vmatprep.subr.mxu1 %v1009_v2 }
 0x135   : > { %894 = vmatpush3.msra.mxu1 %v1211_v17 }
 0x1d6   : > { %v363_v25 = vpop.f32.mrf.mxu1 }
 0x1d7   : > { %v367_v26 = vadd.f32 %v666_v24, %v363_v25 }
 0x1d8   : > { %v827_v27 = vpop.f32.mrf.mxu1 }
 0x1d9   : > { %961 = vtanh.f32 %v367_v26 }
 0x1e6   : > { %v962_v28 = vpop.eup %961 }
 0x1e7   : > { %861 = vmatmul.mubr.f32.vlgmr.msra.gmra.mxu0 %v962_v28 }
 0x2a7   : > { %v437_v30 = vpop.f32.mrf.mxu0 }
 0x2a8   : > { %v441_v31 = vadd.f32 %v667_v29, %v437_v30 }
 0x2a9   : > { %v862_v32 = vpop.f32.mrf.mxu0 }
 0x2aa   : > { %963 = vtanh.f32 %v441_v31 }
 0x2b7   : > { %v964_v33 = vpop.eup %963 }
 0x2b8   : > { %896 = vmatmul.mubr.f32.vlgmr.msra.gmra.mxu1 %v964_v33 }
 0x378   : > { %v511_v35 = vpop.f32.mrf.mxu1 }
 0x379   : > { %v515_v36 = vadd.f32 %v668_v34, %v511_v35 }
 0x37a   : > { %v897_v37 = vpop.f32.mrf.mxu1 }
 0x37b   : > { %965 = vtanh.f32 %v515_v36 }
 0x385   : > { %521 = sbr.rel (%p669_p2) target bundleno = 1135 (0x46f), region = 48 }
 0x388   : > { %v966_v38 = vpop.eup %965 }
 0x389   : > { %517 = vst [vmem:[#allocation2] sm:$0xff] %v966_v38 }
 0x38a   : > { %v538_v39 = vld [vmem:[#allocation3 + $0x78] sm:$0xff]  ;;  %v1011_v40 = vmov 0.0   ;;  %v537_v41 = vld [vmem:[#allocation3 + $0x70] sm:$0xff]  ;;  %vm1012_vm1 = vmmov 0   ;;  %v536_v42 = vld [vmem:[#allocation3 + $0x68] sm:$0xff] }
 0x38b   : > { %898 = vmatprep.subr.mxu0 %v1011_v40  ;;  %930 = vmatprep.mubr.msk.f32.mxu0 %vm1012_vm1, %v1011_v40  ;;  %v535_v43 = vld [vmem:[#allocation3 + $0x60] sm:$0xff]  ;;  %v534_v44 = vld [vmem:[#allocation3 + $0x58] sm:$0xff]  ;;  %v533_v45 = vld [vmem:[#allocation3 + $0x50] sm:$0xff] }
 0x38c   : > { %899 = vmatpush3.msra.mxu0 %v538_v39  ;;  %v532_v46 = vld [vmem:[#allocation3 + $0x48] sm:$0xff]  ;;  %v531_v47 = vld [vmem:[#allocation3 + $0x40] sm:$0xff]  ;;  %v530_v48 = vld [vmem:[#allocation3 + $0x38] sm:$0xff] }
 0x38d   : > { %900 = vmatprep.subr.mxu0 %v1011_v40  ;;  %v529_v49 = vld [vmem:[#allocation3 + $0x30] sm:$0xff]  ;;  %v528_v50 = vld [vmem:[#allocation3 + $0x28] sm:$0xff]  ;;  %v527_v51 = vld [vmem:[#allocation3 + $0x20] sm:$0xff] }
 0x38e   : > { %901 = vmatpush3.msra.mxu0 %v537_v41  ;;  %v526_v52 = vld [vmem:[#allocation3 + $0x18] sm:$0xff]  ;;  %v525_v53 = vld [vmem:[#allocation3 + $0x10] sm:$0xff]  ;;  %v524_v54 = vld [vmem:[#allocation3 + $0x8] sm:$0xff] }
 0x38f   : > { %902 = vmatprep.subr.mxu0 %v1011_v40  ;;  %v523_v55 = vld [vmem:[#allocation3] sm:$0xff]  ;;  %v670_v57 = vld [vmem:[%s1308_s3] ss:$0 sm:$0xff] }
 0x390   : > { %903 = vmatpush3.msra.mxu0 %v536_v42  ;;  %v522_v56 = vld [vmem:[#allocation2] sm:$0xff] }
 0x391   : > { %904 = vmatprep.subr.mxu0 %v1011_v40 }
 0x392   : > { %905 = vmatpush3.msra.mxu0 %v535_v43 }
 0x393   : > { %906 = vmatprep.subr.mxu0 %v1011_v40 }
 0x394   : > { %907 = vmatpush3.msra.mxu0 %v534_v44 }
 0x395   : > { %908 = vmatprep.subr.mxu0 %v1011_v40 }
 0x396   : > { %909 = vmatpush3.msra.mxu0 %v533_v45 }
 0x397   : > { %910 = vmatprep.subr.mxu0 %v1011_v40 }
 0x398   : > { %911 = vmatpush3.msra.mxu0 %v532_v46 }
 0x399   : > { %912 = vmatprep.subr.mxu0 %v1011_v40 }
 0x39a   : > { %913 = vmatpush3.msra.mxu0 %v531_v47 }
 0x39b   : > { %914 = vmatprep.subr.mxu0 %v1011_v40 }
 0x39c   : > { %915 = vmatpush3.msra.mxu0 %v530_v48 }
 0x39d   : > { %916 = vmatprep.subr.mxu0 %v1011_v40 }
 0x39e   : > { %917 = vmatpush3.msra.mxu0 %v529_v49 }
 0x39f   : > { %918 = vmatprep.subr.mxu0 %v1011_v40 }
 0x3a0   : > { %919 = vmatpush3.msra.mxu0 %v528_v50 }
 0x3a1   : > { %920 = vmatprep.subr.mxu0 %v1011_v40 }
 0x3a2   : > { %921 = vmatpush3.msra.mxu0 %v527_v51 }
 0x3a3   : > { %922 = vmatprep.subr.mxu0 %v1011_v40 }
 0x3a4   : > { %923 = vmatpush3.msra.mxu0 %v526_v52 }
 0x3a5   : > { %924 = vmatprep.subr.mxu0 %v1011_v40 }
 0x3a6   : > { %925 = vmatpush3.msra.mxu0 %v525_v53 }
 0x3a7   : > { %926 = vmatprep.subr.mxu0 %v1011_v40 }
 0x3a8   : > { %927 = vmatpush3.msra.mxu0 %v524_v54 }
 0x3a9   : > { %928 = vmatprep.subr.mxu0 %v1011_v40 }
 0x3aa   : > { %929 = vmatpush3.msra.mxu0 %v523_v55 }
 0x3ab   : > { %931 = vmatmul.mubr.f32.vlgmr.msra.gmra.mxu0 %v522_v56 }
 0x46b   : > { %v612_v58 = vpop.f32.mrf.mxu0 }
 0x46c   : > { %v613_v59 = vadd.f32 %v670_v57, %v612_v58 }
 0x46d   : > { %v932_v60 = vpop.f32.mrf.mxu0 }
 0x46e   : > { %616 = vst [vmem:[%s1309_s4] sm:$0xff] %v613_v59 }
 0x46f PF: > { %s15_s15 = sadd.s32 1, %s1003_s15  }
 0x470   : > { %p12_p3 = scmp.ge.s32.totalorder %s15_s15, 4  }
 0x472   :  { %14 = sbr.rel (!%p12_p3) target bundleno = 1 (0x1), region = 78 }
 0x477   :  { %628 = vsyncpa [#allocation4], 1 }
 0x478   :  { %630 = vsyncpa [#allocation4 + $0x1], 1 }

</bundles_post_ra>
